<compile_context>
chip_gen: v7x
topology: tpu7x:2x2x1
jax: 0.10.0
libtpu: 0.0.40
codegen_flags: <defaults>
</compile_context>

<pallas_src>
import jax
import jax.numpy as jnp
from jax.experimental import pallas as pl
from jax.experimental.pallas import tpu as pltpu

_LANES = 128                    # TPU vreg lane width
_MAX_LANE_WIDTH = 4096          # widest lane-dense 2-D view we try
_MIN_CHUNK_BYTES = 512 * 1024   # don't split DMAs smaller than ~0.5 MiB
_MAX_CHUNKS = 8                 # cap on concurrent DMA descriptors


def _lane_width(total: int) -> int:
    """Largest multiple of 128 that divides `total`, capped at _MAX_LANE_WIDTH."""
    best = 0
    c = _LANES
    while c <= _MAX_LANE_WIDTH:
        if total % c == 0:
            best = c
        c += _LANES
    return best


def _make_dma_copy_kernel(chunks):
    """HBM->HBM identity copy via concurrent DMAs over static row-chunks."""
    def kernel(x_hbm, o_hbm, sem):
        copies = []
        for c, (start, size) in enumerate(chunks):
            cp = pltpu.make_async_copy(
                x_hbm.at[pl.ds(start, size)],
                o_hbm.at[pl.ds(start, size)],
                sem.at[c],
            )
            cp.start()
            copies.append(cp)
        for cp in copies:
            cp.wait()
    return kernel


def squeeze_dim_neg6_metadata_only(a: jax.Array) -> jax.Array:
    """The truly optimal version: squeeze of a size-1 dim is metadata-only."""
    return jax.lax.squeeze(a, (0,))


def _squeeze_dim_neg6_impl(a: jax.Array) -> jax.Array:
    """Equivalent of torch.squeeze(a, -6) for a 6-D input with a.shape[0] == 1."""
    assert a.ndim == 6, "expected a 6-D input"
    assert a.shape[0] == 1, "dim -6 must have size 1 to be squeezed"
    out_shape = a.shape[1:]

    total = a.size
    itemsize = jnp.dtype(a.dtype).itemsize
    if total == 0:
        # Degenerate empty tensor: nothing to copy; squeeze is metadata-only.
        return a.reshape(out_shape)

    # Lane-dense 2-D view when possible (always true for this module family,
    # since 384 = 3 * 128); otherwise a flat 1-D view.
    lanes = _lane_width(total)
    if lanes:
        rows = total // lanes
        view_shape = (rows, lanes)
    else:
        rows = total
        view_shape = (total,)

    # Static chunking along dim 0 so several DMA engines can stream in
    # parallel for large tensors.  Small tensors use a single DMA.
    bytes_total = total * itemsize
    n_chunks = int(max(1, min(_MAX_CHUNKS, rows, bytes_total // _MIN_CHUNK_BYTES)))
    base, rem = divmod(rows, n_chunks)
    chunks = []
    start = 0
    for c in range(n_chunks):
        size = base + (1 if c < rem else 0)
        chunks.append((start, size))
        start += size
    chunks = tuple(chunks)

    x_view = a.reshape(view_shape)   # metadata-only under jit

    out_view = pl.pallas_call(
        _make_dma_copy_kernel(chunks),
        out_shape=jax.ShapeDtypeStruct(view_shape, a.dtype),
        in_specs=[pl.BlockSpec(memory_space=pl.ANY)],
        out_specs=pl.BlockSpec(memory_space=pl.ANY),
        scratch_shapes=[pltpu.SemaphoreType.DMA((n_chunks,))],
        cost_estimate=pl.CostEstimate(
            flops=0, transcendentals=0, bytes_accessed=2 * bytes_total),
    )(x_view)

    return out_view.reshape(out_shape)   # metadata-only under jit


# jit so the surrounding reshapes stay metadata-only (no extra HBM copies).
squeeze_dim_neg6 = jax.jit(_squeeze_dim_neg6_impl)


if __name__ == "__main__":
    key = jax.random.PRNGKey(0)
    # Shape consistent with the module annotation [1, -1, 1, 384, -1, 1]:
    # pick d1 = 2, d4 = 8 (small).
    a = jax.random.normal(key, (1, 2, 1, 384, 8, 1), dtype=jnp.float32)

    out = squeeze_dim_neg6(a)
    out = jax.block_until_ready(out)

    expected = jnp.squeeze(a, axis=0)
    assert out.shape == (2, 1, 384, 8, 1), out.shape
    assert out.dtype == jnp.float32
    assert bool(jnp.array_equal(out, expected))

    print("KERNEL_OK")
</pallas_src>

<mosaic_0001>
module attributes {stable_mosaic.version = 11 : i64} {
  func.func @kernel(%arg0: memref<2x3072xf32, #tpu.memory_space<any>>, %arg1: memref<2x3072xf32, #tpu.memory_space<any>>, %arg2: memref<1x!tpu.dma_semaphore, #tpu.memory_space<semaphore_mem>>) attributes {dimension_semantics = [], scalar_prefetch = 0 : i64, scratch_operands = 1 : i64, tpu.core_type = #tpu.core_type<tc>} {
    %c0_i32 = arith.constant 0 : i32
    %c0_i32_0 = arith.constant 0 : i32
    %c0_i32_1 = arith.constant 0 : i32
    %0 = tpu.memref_slice %arg0[%c0_i32_0, %c0_i32_1] : memref<2x3072xf32, #tpu.memory_space<any>> -> memref<2x3072xf32, #tpu.memory_space<any>>
    %c0_i32_2 = arith.constant 0 : i32
    %c0_i32_3 = arith.constant 0 : i32
    %1 = tpu.memref_slice %arg1[%c0_i32_2, %c0_i32_3] : memref<2x3072xf32, #tpu.memory_space<any>> -> memref<2x3072xf32, #tpu.memory_space<any>>
    %2 = tpu.memref_slice %arg2[%c0_i32] : memref<1x!tpu.dma_semaphore, #tpu.memory_space<semaphore_mem>> -> memref<1x!tpu.dma_semaphore, #tpu.memory_space<semaphore_mem>>
    %3 = tpu.memref_squeeze %2 : memref<1x!tpu.dma_semaphore, #tpu.memory_space<semaphore_mem>> -> memref<!tpu.dma_semaphore, #tpu.memory_space<semaphore_mem>>
    tpu.enqueue_dma source(%0 : memref<2x3072xf32, #tpu.memory_space<any>>) target(%1 : memref<2x3072xf32, #tpu.memory_space<any>>) target_semaphore(%3 : memref<!tpu.dma_semaphore, #tpu.memory_space<semaphore_mem>>)
    %c0_i32_4 = arith.constant 0 : i32
    %c0_i32_5 = arith.constant 0 : i32
    %c0_i32_6 = arith.constant 0 : i32
    %4 = tpu.memref_slice %arg0[%c0_i32_5, %c0_i32_6] : memref<2x3072xf32, #tpu.memory_space<any>> -> memref<2x3072xf32, #tpu.memory_space<any>>
    %c0_i32_7 = arith.constant 0 : i32
    %c0_i32_8 = arith.constant 0 : i32
    %5 = tpu.memref_slice %arg1[%c0_i32_7, %c0_i32_8] : memref<2x3072xf32, #tpu.memory_space<any>> -> memref<2x3072xf32, #tpu.memory_space<any>>
    %6 = tpu.memref_slice %arg2[%c0_i32_4] : memref<1x!tpu.dma_semaphore, #tpu.memory_space<semaphore_mem>> -> memref<1x!tpu.dma_semaphore, #tpu.memory_space<semaphore_mem>>
    %7 = tpu.memref_squeeze %6 : memref<1x!tpu.dma_semaphore, #tpu.memory_space<semaphore_mem>> -> memref<!tpu.dma_semaphore, #tpu.memory_space<semaphore_mem>>
    tpu.wait_dma2 semaphore(%7 : memref<!tpu.dma_semaphore, #tpu.memory_space<semaphore_mem>>) src(%4 : memref<2x3072xf32, #tpu.memory_space<any>>) dst(%5 : memref<2x3072xf32, #tpu.memory_space<any>>)
    return
  }
}

</mosaic_0001>

<bundles_post_ra>
// kernel: _squeeze_dim_neg6_impl.1
= control target key start
LH: loop header
LB: loop body
LE: loop exit
PB: predicated region body
PF: predicated region fallthrough
CT: control target
= control target key end

     0   :  { %s125_s0 = inlined_call_operand.vmem [shape: f32[2,3072], index: 0, kind: input, shape index: {}]   ;;  %s126_s1 = inlined_call_operand.vmem [shape: f32[2,3072], index: 1, kind: output, shape index: {}]  }
   0x1   :  { %v38_v0 = vld [vmem:[%s125_s0] sm:$0xff]  ;;  %v40_v1 = vld [vmem:[%s125_s0 + $0x8] sm:$0xff]  ;;  %v42_v2 = vld [vmem:[%s125_s0 + $0x10] sm:$0xff] }
   0x2   :  { %39 = vst [vmem:[%s126_s1] sm:$0xff] %v38_v0  ;;  %41 = vst [vmem:[%s126_s1 + $0x8] sm:$0xff] %v40_v1  ;;  %v44_v3 = vld [vmem:[%s125_s0 + $0x18] sm:$0xff]  ;;  %v46_v4 = vld [vmem:[%s125_s0 + $0x20] sm:$0xff] }
   0x3   :  { %43 = vst [vmem:[%s126_s1 + $0x10] sm:$0xff] %v42_v2  ;;  %v48_v5 = vld [vmem:[%s125_s0 + $0x28] sm:$0xff]  ;;  %45 = vst [vmem:[%s126_s1 + $0x18] sm:$0xff] %v44_v3 }
   0x4   :  { %47 = vst [vmem:[%s126_s1 + $0x20] sm:$0xff] %v46_v4  ;;  %49 = vst [vmem:[%s126_s1 + $0x28] sm:$0xff] %v48_v5 }
   0x5   :  { %57 = vsyncadd [#allocation2], 768 }
   0x6   :  { %77 = dma.done.wait [#allocation2], 768 }
   0x7   :  { %78 = vsyncadd [#allocation2], 4294966528 }
   0x8   :  { %62 = vsyncmov [#allocation2] }
   0xb   :  { %s63_s30 = vpop.sfrf %62 }
   0xc   :  { %p76_p0 = scmp.ne.s32.totalorder %s63_s30, 0 }
   0xe   :  { %67 = shalt.err (%p76_p0)  }

</bundles_post_ra>
